<compile_context>
chip_gen: v5e
topology: v5e:2x2
jax: 0.10.0
libtpu: 0.0.40
codegen_flags: <defaults>
</compile_context>

<pallas_src>
import functools

import jax
import jax.numpy as jnp
from jax import lax
from jax.experimental import pallas as pl
from jax.experimental.pallas import tpu as pltpu


def _rup(x, m):
    return ((x + m - 1) // m) * m


def _cdiv(a, b):
    return -(-a // b)


@functools.lru_cache(maxsize=1)
def _hw_info():
    """Device kind string + per-core VMEM capacity (conservative fallbacks)."""
    kind = ""
    cap = 64 * 1024 * 1024
    try:
        kind = jax.devices()[0].device_kind.lower()
    except Exception:
        pass
    try:
        cap = int(pltpu.get_tpu_info().vmem_capacity_bytes)
    except Exception:
        pass
    return kind, cap


def _choose_tiles(OH, OW, KIC, K, OCp, N, stride, dilation):
    """Generation-aware (TM, TN, n_oc, vmem_limit_bytes)."""
    kind, cap = _hw_info()

    # v5e: 4x128^2 MXU, single vst slot -> TN=128.  v6e/v7x: 256-wide MXU.
    TN = 128 if ("v4" in kind or "v5" in kind or OCp % 256 != 0) else 256
    n_oc = OCp // TN

    # Scoped VMEM target: ~40 MiB on v7x (64 MiB physical), <=100 MiB on v5e/v6e.
    vmem_limit = int(min(0.62 * cap, 100 * 1024 * 1024))
    budget = int(0.80 * vmem_limit)

    def resident(tm):
        rh = (tm - 1) * stride + dilation * (K - 1) + 1
        x_b = 2 * rh * _rup(OW, 8) * _rup(KIC, 128) * 2   # input slab (double-buffered, bf16)
        w_b = 2 * K * _rup(KIC, 8) * TN * 2               # weight taps (double-buffered, bf16)
        o_b = 2 * tm * OW * TN * 4                         # output block (double-buffered, f32)
        t_b = tm * OW * TN * 4                             # matmul partial temp
        return x_b + w_b + o_b + t_b

    tm_hi = max(8, min(_rup(OH, 8), 256))
    TM = 8
    for t in range(tm_hi, 7, -8):                          # largest row tile that fits
        if resident(t) <= budget:
            TM = t
            break

    # Megacore (v7x, 2 TCs): keep at least 2 parallel grid cells for small batch.
    if N * _cdiv(OH, TM) < 2 and OH > 8:
        TM = max(8, _rup(_cdiv(OH, 2), 8))

    vmem_limit = int(min(0.90 * cap, max(vmem_limit, int(1.25 * resident(TM)))))
    vmem_limit = max(vmem_limit, 16 * 1024 * 1024)
    return TM, TN, n_oc, vmem_limit


# ---------------------------------------------------------------------------
# Pallas kernel: one (batch*row-tile, oc-tile) grid cell.
#   x_ref: (1, RH, OW, K*IC) bf16  -- row slab, kw taps packed in the lane dim
#   w_ref: (K, K*IC, TN)     bf16  -- per-kh (mask-folded) weight slabs
#   o_ref: (1, TM*OW, TN)    f32   -- lane-dense output block (accumulated here)
# ---------------------------------------------------------------------------
def _expander_conv_kernel(x_ref, w_ref, o_ref, *, K, TM, OW, stride, dilation):
    for kh in range(K):                       # static unroll over the K row taps
        h0 = kh * dilation
        if stride == 1:
            lhs = x_ref[0, h0:h0 + TM, :, :]                     # (TM, OW, K*IC)
        else:
            # TODO(synk): strided sublane slice; space-to-depth in the wrapper
            # would make this a dense load for stride-2 layers.
            lhs = x_ref[0, pl.ds(h0, TM, stride), :, :]
        part = jnp.dot(lhs.reshape(TM * OW, -1), w_ref[kh],
                       preferred_element_type=jnp.float32)        # (TM*OW, TN)
        if kh == 0:
            o_ref[0] = part            # overwrite (no init pass, no SSA acc)
        else:
            o_ref[0] += part           # accumulate in the f32 output block


# ---------------------------------------------------------------------------
# ExpanderConv2d forward (groups=1): NCHW in, NCHW out (PyTorch convention)
# ---------------------------------------------------------------------------
@functools.partial(
    jax.jit, static_argnames=("kernel_size", "stride", "padding", "dilation"))
def expander_conv2d(x, weight, mask, *, kernel_size, stride=1, padding=0,
                    dilation=1):
    N, IC, H, W = x.shape
    OC = weight.shape[0]
    K = kernel_size
    assert weight.shape == (OC, IC, K, K)
    # TODO(synk): groups > 1 not implemented (module default is groups=1).

    KIC = K * IC
    OCp = _rup(OC, 128)

    Hp, Wp = H + 2 * padding, W + 2 * padding
    OH = (Hp - dilation * (K - 1) - 1) // stride + 1
    OW = (Wp - dilation * (K - 1) - 1) // stride + 1

    TM, TN, n_oc, vmem_limit = _choose_tiles(OH, OW, KIC, K, OCp, N,
                                             stride, dilation)
    n_rows = _cdiv(OH, TM)
    RH = (TM - 1) * stride + dilation * (K - 1) + 1      # input rows per tile

    # 1) Fold the fixed expander mask into the weight once; per-kh slabs with
    #    the kw taps flattened into the contraction dim: (K, K*IC, OCp), bf16.
    wt = jnp.transpose(weight * mask, (2, 3, 1, 0)).reshape(K, KIC, OC)
    wt = jnp.pad(wt, ((0, 0), (0, 0), (0, OCp - OC))).astype(jnp.bfloat16)

    # 2) NCHW -> NHWC, zero pad spatially, bf16 (cheap fused XLA ops).
    xp = jnp.pad(jnp.transpose(x, (0, 2, 3, 1)).astype(jnp.bfloat16),
                 ((0, 0), (padding, padding), (padding, padding), (0, 0)))

    # 3) Pack the K kw taps (and the W stride/dilation) into the lane dim:
    #    xw[n, h, ow, kw*IC + c] = xp[n, h, ow*stride + kw*dilation, c]
    xw = jnp.concatenate(
        [xp[:, :, kw * dilation: kw * dilation + (OW - 1) * stride + 1: stride, :]
         for kw in range(K)], axis=-1)                    # (N, Hp, OW, K*IC)

    # 4) Overlapping row slabs (halo = dilation*(K-1) rows) so each grid cell
    #    only DMAs the rows it needs; Pallas double-buffers these small slabs.
    H_need = (n_rows * TM - 1) * stride + dilation * (K - 1) + 1
    if H_need > Hp:
        xw = jnp.pad(xw, ((0, 0), (0, H_need - Hp), (0, 0), (0, 0)))
    xs = jnp.stack(
        [lax.slice_in_dim(xw, r * TM * stride, r * TM * stride + RH, axis=1)
         for r in range(n_rows)], axis=1)                 # (N, n_rows, RH, OW, K*IC)
    xs = xs.reshape(N * n_rows, RH, OW, KIC)

    kernel = functools.partial(_expander_conv_kernel, K=K, TM=TM, OW=OW,
                               stride=stride, dilation=dilation)

    NR = N * n_rows
    flops = 2 * NR * TM * OW * (K * KIC) * OCp
    bytes_accessed = (NR * RH * OW * KIC * 2              # x slab: read once per row tile
                      + NR * n_oc * K * KIC * TN * 2      # weights: streamed per grid cell
                      + NR * TM * OW * OCp * 4)           # output: written once

    out = pl.pallas_call(
        kernel,
        out_shape=jax.ShapeDtypeStruct((NR, TM * OW, OCp), jnp.float32),
        grid_spec=pltpu.PrefetchScalarGridSpec(
            num_scalar_prefetch=0,
            grid=(NR, n_oc),            # oc innermost -> x slab stays VMEM-resident
            in_specs=[
                pl.BlockSpec((1, RH, OW, KIC), lambda i, j: (i, 0, 0, 0)),
                pl.BlockSpec((K, KIC, TN),     lambda i, j: (0, 0, j)),
            ],
            out_specs=pl.BlockSpec((1, TM * OW, TN), lambda i, j: (i, 0, j)),
        ),
        compiler_params=pltpu.CompilerParams(
            dimension_semantics=("parallel", "arbitrary"),
            vmem_limit_bytes=vmem_limit,
        ),
        cost_estimate=pl.CostEstimate(flops=flops, transcendentals=0,
                                      bytes_accessed=bytes_accessed),
    )(xs, wt)

    # 5) Drop row / OC padding, return NCHW to match the PyTorch module.
    out = out.reshape(N, n_rows * TM, OW, OCp)[:, :OH, :, :OC]
    return jnp.transpose(out, (0, 3, 1, 2))


# ---------------------------------------------------------------------------
# Deterministic parameter / mask construction (mirrors the module __init__)
# ---------------------------------------------------------------------------
def make_params(key, in_channels, out_channels, kernel_size, expand_size):
    k_w, k_m = jax.random.split(key)
    # kaiming_normal, mode='fan_out': std = sqrt(2 / (OC * K * K))
    fan_out = out_channels * kernel_size * kernel_size
    std = (2.0 / fan_out) ** 0.5
    weight = std * jax.random.normal(
        k_w, (out_channels, in_channels, kernel_size, kernel_size), jnp.float32)

    mask11 = jnp.zeros((out_channels, in_channels), jnp.float32)
    if in_channels > out_channels:
        for i in range(out_channels):
            k_m, sub = jax.random.split(k_m)
            perm = jax.random.permutation(sub, in_channels)
            mask11 = mask11.at[i, perm[:expand_size]].set(1.0)
    else:
        for i in range(in_channels):
            k_m, sub = jax.random.split(k_m)
            perm = jax.random.permutation(sub, out_channels)
            mask11 = mask11.at[perm[:expand_size], i].set(1.0)
    mask = jnp.broadcast_to(
        mask11[:, :, None, None],
        (out_channels, in_channels, kernel_size, kernel_size))
    return weight, mask


if __name__ == "__main__":
    key = jax.random.PRNGKey(0)
    k_x, k_p = jax.random.split(key)

    # Small shapes consistent with the module.
    N, IC, H, W = 2, 8, 16, 16
    OC, K, expand_size = 4, 3, 2
    stride, padding, dilation = 1, 1, 1

    x = jax.random.normal(k_x, (N, IC, H, W), jnp.float32)
    weight, mask = make_params(k_p, IC, OC, K, expand_size)

    out = expander_conv2d(x, weight, mask, kernel_size=K, stride=stride,
                          padding=padding, dilation=dilation)
    out = jax.block_until_ready(out)

    # Reference: XLA conv with the same masked weights and the same bf16
    # operand / f32 accumulation numerics as the kernel.
    ref = lax.conv_general_dilated(
        x.astype(jnp.bfloat16), (weight * mask).astype(jnp.bfloat16),
        window_strides=(stride, stride),
        padding=[(padding, padding), (padding, padding)],
        rhs_dilation=(dilation, dilation),
        dimension_numbers=("NCHW", "OIHW", "NCHW"),
        preferred_element_type=jnp.float32,
    )
    assert out.shape == (N, OC, H, W), out.shape
    err = float(jnp.max(jnp.abs(out - ref)))
    assert jnp.allclose(out, ref, atol=2e-3, rtol=2e-3), err

    print("KERNEL_OK")
</pallas_src>

<mosaic_0001>
module attributes {stable_mosaic.version = 11 : i64} {
  func.func @_expander_conv_kernel(%arg0: i32, %arg1: i32, %arg2: memref<1x18x16x24xbf16, #tpu.memory_space<vmem>>, %arg3: memref<3x24x128xbf16, #tpu.memory_space<vmem>>, %arg4: memref<1x256x128xf32, #tpu.memory_space<vmem>>) attributes {dimension_semantics = [#tpu.dimension_semantics<parallel>, #tpu.dimension_semantics<arbitrary>], iteration_bounds = array<i64: 2, 1>, scalar_prefetch = 0 : i64, scratch_operands = 0 : i64, tpu.core_type = #tpu.core_type<tc>, window_params = [{transform_indices = @transform_0, window_bounds = array<i64: 1, 18, 16, 24>}, {transform_indices = @transform_1, window_bounds = array<i64: 3, 24, 128>}, {transform_indices = @transform_2, window_bounds = array<i64: 1, 256, 128>}]} {
    %c0 = arith.constant 0 : index
    %c0_0 = arith.constant 0 : index
    %c0_1 = arith.constant 0 : index
    %c0_2 = arith.constant 0 : index
    %0 = vector.load %arg2[%c0, %c0_0, %c0_1, %c0_2] : memref<1x18x16x24xbf16, #tpu.memory_space<vmem>>, vector<1x16x16x24xbf16>
    %1 = vector.shape_cast %0 : vector<1x16x16x24xbf16> to vector<16x16x24xbf16>
    %2 = vector.shape_cast %1 : vector<16x16x24xbf16> to vector<256x24xbf16>
    %c0_3 = arith.constant 0 : index
    %c0_4 = arith.constant 0 : index
    %c0_5 = arith.constant 0 : index
    %3 = vector.load %arg3[%c0_3, %c0_4, %c0_5] : memref<3x24x128xbf16, #tpu.memory_space<vmem>>, vector<1x24x128xbf16>
    %4 = vector.shape_cast %3 : vector<1x24x128xbf16> to vector<24x128xbf16>
    %cst = arith.constant dense<0.000000e+00> : vector<256x128xf32>
    %5 = tpu.matmul %2, %4, %cst {dimension_numbers = #tpu.dot_dimension_numbers<[1], [0], [0], [1], [0, 0, 1, 1], [], []>} : vector<256x24xbf16>, vector<24x128xbf16>, vector<256x128xf32> -> vector<256x128xf32>
    %c0_6 = arith.constant 0 : index
    %c0_7 = arith.constant 0 : index
    %c0_8 = arith.constant 0 : index
    %6 = vector.load %arg4[%c0_6, %c0_7, %c0_8] : memref<1x256x128xf32, #tpu.memory_space<vmem>>, vector<1x256x128xf32>
    %7 = vector.shape_cast %6 : vector<1x256x128xf32> to vector<256x128xf32>
    %8 = vector.shape_cast %5 : vector<256x128xf32> to vector<1x256x128xf32>
    tpu.vector_store %arg4[%c0_6, %c0_7, %c0_8], %8 {strides = array<i32>} : memref<1x256x128xf32, #tpu.memory_space<vmem>>, vector<1x256x128xf32>,
    %c0_9 = arith.constant 0 : index
    %c1 = arith.constant 1 : index
    %c0_10 = arith.constant 0 : index
    %c0_11 = arith.constant 0 : index
    %9 = vector.load %arg2[%c0_9, %c1, %c0_10, %c0_11] : memref<1x18x16x24xbf16, #tpu.memory_space<vmem>>, vector<1x16x16x24xbf16>
    %10 = vector.shape_cast %9 : vector<1x16x16x24xbf16> to vector<16x16x24xbf16>
    %11 = vector.shape_cast %10 : vector<16x16x24xbf16> to vector<256x24xbf16>
    %c1_12 = arith.constant 1 : index
    %c0_13 = arith.constant 0 : index
    %c0_14 = arith.constant 0 : index
    %12 = vector.load %arg3[%c1_12, %c0_13, %c0_14] : memref<3x24x128xbf16, #tpu.memory_space<vmem>>, vector<1x24x128xbf16>
    %13 = vector.shape_cast %12 : vector<1x24x128xbf16> to vector<24x128xbf16>
    %cst_15 = arith.constant dense<0.000000e+00> : vector<256x128xf32>
    %14 = tpu.matmul %11, %13, %cst_15 {dimension_numbers = #tpu.dot_dimension_numbers<[1], [0], [0], [1], [0, 0, 1, 1], [], []>} : vector<256x24xbf16>, vector<24x128xbf16>, vector<256x128xf32> -> vector<256x128xf32>
    %c0_16 = arith.constant 0 : index
    %c0_17 = arith.constant 0 : index
    %c0_18 = arith.constant 0 : index
    %15 = vector.load %arg4[%c0_16, %c0_17, %c0_18] : memref<1x256x128xf32, #tpu.memory_space<vmem>>, vector<1x256x128xf32>
    %16 = vector.shape_cast %15 : vector<1x256x128xf32> to vector<256x128xf32>
    %17 = arith.addf %16, %14 : vector<256x128xf32>
    %c0_19 = arith.constant 0 : index
    %c0_20 = arith.constant 0 : index
    %c0_21 = arith.constant 0 : index
    %18 = vector.load %arg4[%c0_19, %c0_20, %c0_21] : memref<1x256x128xf32, #tpu.memory_space<vmem>>, vector<1x256x128xf32>
    %19 = vector.shape_cast %18 : vector<1x256x128xf32> to vector<256x128xf32>
    %20 = vector.shape_cast %17 : vector<256x128xf32> to vector<1x256x128xf32>
    tpu.vector_store %arg4[%c0_19, %c0_20, %c0_21], %20 {strides = array<i32>} : memref<1x256x128xf32, #tpu.memory_space<vmem>>, vector<1x256x128xf32>,
    %c0_22 = arith.constant 0 : index
    %c2 = arith.constant 2 : index
    %c0_23 = arith.constant 0 : index
    %c0_24 = arith.constant 0 : index
    %21 = vector.load %arg2[%c0_22, %c2, %c0_23, %c0_24] : memref<1x18x16x24xbf16, #tpu.memory_space<vmem>>, vector<1x16x16x24xbf16>
    %22 = vector.shape_cast %21 : vector<1x16x16x24xbf16> to vector<16x16x24xbf16>
    %23 = vector.shape_cast %22 : vector<16x16x24xbf16> to vector<256x24xbf16>
    %c2_25 = arith.constant 2 : index
    %c0_26 = arith.constant 0 : index
    %c0_27 = arith.constant 0 : index
    %24 = vector.load %arg3[%c2_25, %c0_26, %c0_27] : memref<3x24x128xbf16, #tpu.memory_space<vmem>>, vector<1x24x128xbf16>
    %25 = vector.shape_cast %24 : vector<1x24x128xbf16> to vector<24x128xbf16>
    %cst_28 = arith.constant dense<0.000000e+00> : vector<256x128xf32>
    %26 = tpu.matmul %23, %25, %cst_28 {dimension_numbers = #tpu.dot_dimension_numbers<[1], [0], [0], [1], [0, 0, 1, 1], [], []>} : vector<256x24xbf16>, vector<24x128xbf16>, vector<256x128xf32> -> vector<256x128xf32>
    %c0_29 = arith.constant 0 : index
    %c0_30 = arith.constant 0 : index
    %c0_31 = arith.constant 0 : index
    %27 = vector.load %arg4[%c0_29, %c0_30, %c0_31] : memref<1x256x128xf32, #tpu.memory_space<vmem>>, vector<1x256x128xf32>
    %28 = vector.shape_cast %27 : vector<1x256x128xf32> to vector<256x128xf32>
    %29 = arith.addf %28, %26 : vector<256x128xf32>
    %c0_32 = arith.constant 0 : index
    %c0_33 = arith.constant 0 : index
    %c0_34 = arith.constant 0 : index
    %30 = vector.load %arg4[%c0_32, %c0_33, %c0_34] : memref<1x256x128xf32, #tpu.memory_space<vmem>>, vector<1x256x128xf32>
    %31 = vector.shape_cast %30 : vector<1x256x128xf32> to vector<256x128xf32>
    %32 = vector.shape_cast %29 : vector<256x128xf32> to vector<1x256x128xf32>
    tpu.vector_store %arg4[%c0_32, %c0_33, %c0_34], %32 {strides = array<i32>} : memref<1x256x128xf32, #tpu.memory_space<vmem>>, vector<1x256x128xf32>,
    return
  }
  func.func @transform_0(%arg0: i32, %arg1: i32) -> (i32, i32, i32, i32) {
    %c0_i32 = arith.constant 0 : i32
    %c0_i32_0 = arith.constant 0 : i32
    %c0_i32_1 = arith.constant 0 : i32
    %c0_i32_2 = arith.constant 0 : i32
    return %arg0, %c0_i32, %c0_i32_0, %c0_i32_1 : i32, i32, i32, i32
  }
  func.func @transform_1(%arg0: i32, %arg1: i32) -> (i32, i32, i32) {
    %c0_i32 = arith.constant 0 : i32
    %c0_i32_0 = arith.constant 0 : i32
    %c0_i32_1 = arith.constant 0 : i32
    return %c0_i32, %c0_i32_0, %arg1 : i32, i32, i32
  }
  func.func @transform_2(%arg0: i32, %arg1: i32) -> (i32, i32, i32) {
    %c0_i32 = arith.constant 0 : i32
    %c0_i32_0 = arith.constant 0 : i32
    return %arg0, %c0_i32, %arg1 : i32, i32, i32
  }
}

</mosaic_0001>

<bundles_post_ra>
// kernel: expander_conv2d.1
= control target key start
LH: loop header
LB: loop body
LE: loop exit
PB: predicated region body
PF: predicated region fallthrough
CT: control target
= control target key end

     0   :  { %s1752_s9 = smov 0   ;;  %s1754_s10 = smov 0   ;;  %s1978_s0 = inlined_call_operand.vmem [shape: bf16[2,18,16,24], index: 0, kind: input, shape index: {}]   ;;  %s1979_s1 = inlined_call_operand.vmem [shape: bf16[3,24,128], index: 1, kind: input, shape index: {}]   ;;  %s1980_s2 = inlined_call_operand.vmem [shape: f32[2,256,128], index: 2, kind: output, shape index: {}]  }
   0x1   :  { %s1756_s11 = smov 0  }
   0x2 LB: > { %s24_s12 = sadd.s32 1, %s1731_s10  ;;  %p1302_p0 = scmp.ge.s32.totalorder %s1735_s11, 1  ;;  %s1735_s11 = sphi %s1756_s11, %s12_s11   ;;  %s1731_s10 = sphi %s1754_s10, %s1982_s10   ;;  %s1727_s9 = sphi %s1752_s9, %s1981_s9  }
   0x3   : > { %p26_p1 = scmp.ge.s32.totalorder %s24_s12, 2  ;;  %p135_p2 = scmp.lt.s32.totalorder %s1735_s11, 3 }
   0x5   : > { %s1984_s12 = smov (%p26_p1, %s24_s12), 0  ;;  %p136_p3 = pnand %p1302_p0, %p135_p2 }
   0x6   : > { %p164_p4 = scmp.lt.s32.totalorder (!%p136_p3), %s1727_s9, 1 }
   0x7   : > { %139 = sbr.rel (%p136_p3) target bundleno = 346 (0x15a), region = 28 }
   0xc   : > { %v216_v0 = vld [vmem:[%s1979_s1 + $0x8] sm:$0xf]  ;;  %v1424_v1 = vld [vmem:[%s1979_s1 + $0x14] sm:$0xf]  ;;  %v1543_v4 = vld [vmem:[%s1979_s1 + $0x20] sm:$0xf] }
   0xd   : > { %v302_v2 = vunpack.c.l.b16 %v216_v0  ;;  %v602_v3 = vunpack.c.l.b16 %v1424_v1  ;;  %vm355_vm0 = vcmask 1043456   ;;  %v964_v5 = vunpack.c.l.b16 %v1543_v4  ;;  %s1986_s9 = smov (!%p164_p4, %s1727_s9), 1  ;;  %v1647_v11 = vld [vmem:[%s1979_s1] sm:$0xff]  ;;  %v1664_v13 = vld [vmem:[%s1979_s1 + $0xc] sm:$0xff]  ;;  %v1681_v14 = vld [vmem:[%s1979_s1 + $0x18] sm:$0xff] }
   0xe   : > { %s1688_s19 = smul.u32 144, %s1986_s9  ;;  %vm306_vm1 = vcmask 195584   ;;  %s1630_s29 = sshll.u32 %s1986_s9, 8 }
   0xf   : > { %v304_v6 = vpack.c.b16 %v302_v2, %v302_v2  ;;  %v604_v7 = vpack.c.b16 %v602_v3, %v602_v3  ;;  %v966_v8 = vpack.c.b16 %v964_v5, %v964_v5  ;;  %s1874_s4 = scalar_lea.vmem %s1980_s2, %s1630_s29 }
  0x10   : > { %s1791_s26 = scalar_lea.vmem %s1978_s0, %s1688_s19 }
  0x11   : > { %v357_v9 = vsel %vm355_vm0, %v304_v6, 0  ;;  %v655_v10 = vsel %vm355_vm0, %v604_v7, 0  ;;  %v1017_v12 = vsel %vm355_vm0, %v966_v8, 0  ;;  %v1631_v15 = vld [vmem:[%s1791_s26] sm:$0xff]  ;;  %v1648_v17 = vld [vmem:[%s1791_s26 + $0x8] sm:$0xff]  ;;  %v1665_v18 = vld [vmem:[%s1791_s26 + $0x10] sm:$0xff] }
  0x12   : > { %365 = vmatpush.bf16.msra.mxu0 %v357_v9  ;;  %1682 = vmatpush.bf16.msra.mxu3 %v357_v9  ;;  %v1643_v16 = vld [vmem:[%s1791_s26 + $0x60] sm:$0xff]  ;;  %v1632_v19 = vld [vmem:[%s1791_s26 + $0x8] sm:$0xff]  ;;  %v1649_v21 = vld [vmem:[%s1791_s26 + $0x10] sm:$0xff] }
  0x13   : > { %663 = vmatpush.bf16.msra.mxu1 %v655_v10  ;;  %1025 = vmatpush.bf16.msra.mxu2 %v1017_v12  ;;  %v1644_v20 = vld [vmem:[%s1791_s26 + $0x68] sm:$0xff]  ;;  %v1666_v22 = vld [vmem:[%s1791_s26 + $0x18] sm:$0xff]  ;;  %v1633_v23 = vld [vmem:[%s1791_s26 + $0x10] sm:$0xff] }
  0x14   : > { %v1645_v24 = vld [vmem:[%s1791_s26 + $0x70] sm:$0xff]  ;;  %v1650_v25 = vld [vmem:[%s1791_s26 + $0x18] sm:$0xff]  ;;  %v1667_v26 = vld [vmem:[%s1791_s26 + $0x20] sm:$0xff] }
  0x15   : > { %v1634_v27 = vld [vmem:[%s1791_s26 + $0x18] sm:$0xff]  ;;  %v1651_v29 = vld [vmem:[%s1791_s26 + $0x20] sm:$0xff]  ;;  %v1668_v30 = vld [vmem:[%s1791_s26 + $0x28] sm:$0xff] }
  0x16   : > { %366 = vmatpush.bf16.msra.mxu0 %v1647_v11  ;;  %1683 = vmatpush.bf16.msra.mxu3 %v1647_v11  ;;  %v1646_v28 = vld [vmem:[%s1791_s26 + $0x78] sm:$0xff]  ;;  %v1635_v31 = vld [vmem:[%s1791_s26 + $0x20] sm:$0xff]  ;;  %v1660_v32 = vld [vmem:[%s1791_s26 + $0x68] sm:$0xff] }
  0x17   : > { %664 = vmatpush.bf16.msra.mxu1 %v1664_v13  ;;  %1026 = vmatpush.bf16.msra.mxu2 %v1681_v14  ;;  %v1652_v33 = vld [vmem:[%s1791_s26 + $0x28] sm:$0xff]  ;;  %v1669_v34 = vld [vmem:[%s1791_s26 + $0x30] sm:$0xff]  ;;  %v1670_v38 = vld [vmem:[%s1791_s26 + $0x38] sm:$0xff] }
  0x18   : > { %v1636_v35 = vld [vmem:[%s1791_s26 + $0x28] sm:$0xff]  ;;  %v1661_v36 = vld [vmem:[%s1791_s26 + $0x70] sm:$0xff]  ;;  %v1662_v40 = vld [vmem:[%s1791_s26 + $0x78] sm:$0xff] }
  0x19   : > { %1374 = vmatmul.msk.bf16.vlgmr.msra.gmra.mxu0 %vm306_vm1, %v1631_v15  ;;  %1386 = vmatmul.msk.bf16.vlgmr.msra.gmra.mxu3 %vm306_vm1, %v1643_v16  ;;  %v1653_v37 = vld [vmem:[%s1791_s26 + $0x30] sm:$0xff]  ;;  %v1654_v41 = vld [vmem:[%s1791_s26 + $0x38] sm:$0xff]  ;;  %v1671_v42 = vld [vmem:[%s1791_s26 + $0x40] sm:$0xff] }
  0x1a   : > { %1684 = vmatpush.bf16.msrb.mxu3 %v655_v10  ;;  %1493 = vmatmul.msk.bf16.vlgmr.msra.gmra.mxu1 %vm306_vm1, %v1648_v17  ;;  %v1637_v39 = vld [vmem:[%s1791_s26 + $0x30] sm:$0xff]  ;;  %v1638_v43 = vld [vmem:[%s1791_s26 + $0x38] sm:$0xff]  ;;  %v1663_v44 = vld [vmem:[%s1791_s26 + $0x80] sm:$0xff] }
  0x1b   : > { %1612 = vmatmul.msk.bf16.vlgmr.msra.gmra.mxu2 %vm306_vm1, %v1665_v18  ;;  %v1655_v45 = vld [vmem:[%s1791_s26 + $0x40] sm:$0xff]  ;;  %v1672_v46 = vld [vmem:[%s1791_s26 + $0x48] sm:$0xff]  ;;  %v1677_v48 = vld [vmem:[%s1791_s26 + $0x70] sm:$0xff] }
  0x1c   : > { %v1639_v47 = vld [vmem:[%s1791_s26 + $0x40] sm:$0xff]  ;;  %v1656_v50 = vld [vmem:[%s1791_s26 + $0x48] sm:$0xff]  ;;  %v1673_v51 = vld [vmem:[%s1791_s26 + $0x50] sm:$0xff] }
  0x1d   : > { %v1640_v62 = vld [vmem:[%s1791_s26 + $0x48] sm:$0xff]  ;;  %v1678_v63 = vld [vmem:[%s1791_s26 + $0x78] sm:$0xff]  ;;  %v1657_v2 = vld [vmem:[%s1791_s26 + $0x50] sm:$0xff] }
  0x1e   : > { %1685 = vmatpush.bf16.msrb.mxu3 %v1664_v13  ;;  %v1674_v3 = vld [vmem:[%s1791_s26 + $0x58] sm:$0xff]  ;;  %v1679_v15 = vld [vmem:[%s1791_s26 + $0x80] sm:$0xff] }
  0x1f   : > { %v1658_v18 = vld [vmem:[%s1791_s26 + $0x58] sm:$0xff] }
  0x22   : > { %1686 = vmatpush.bf16.msra.mxu3 %v1017_v12 }
  0x26   : > { %1687 = vmatpush.bf16.msra.mxu3 %v1681_v14  ;;  %v1641_v14 = vld [vmem:[%s1791_s26 + $0x50] sm:$0xff] }
  0x29   : > { %1375 = vmatmul.msk.bf16.gmra.mxu0 %vm306_vm1, %v1632_v19  ;;  %1387 = vmatmul.msk.bf16.gmra.mxu3 %vm306_vm1, %v1644_v20  ;;  %v1675_v19 = vld [vmem:[%s1791_s26 + $0x60] sm:$0xff] }
  0x2a   : > { %1494 = vmatmul.msk.bf16.gmra.mxu1 %vm306_vm1, %v1649_v21 }
  0x2b   : > { %1613 = vmatmul.msk.bf16.gmra.mxu2 %vm306_vm1, %v1666_v22 }
  0x39   : > { %1376 = vmatmul.msk.bf16.gmra.mxu0 %vm306_vm1, %v1633_v23  ;;  %1388 = vmatmul.msk.bf16.gmra.mxu3 %vm306_vm1, %v1645_v24 }
  0x3a   : > { %1495 = vmatmul.msk.bf16.gmra.mxu1 %vm306_vm1, %v1650_v25 }
  0x3b   : > { %1614 = vmatmul.msk.bf16.gmra.mxu2 %vm306_vm1, %v1667_v26 }
  0x49   : > { %1377 = vmatmul.msk.bf16.gmra.mxu0 %vm306_vm1, %v1634_v27  ;;  %1389 = vmatmul.msk.bf16.gmra.mxu3 %vm306_vm1, %v1646_v28 }
  0x4a   : > { %1496 = vmatmul.msk.bf16.gmra.mxu1 %vm306_vm1, %v1651_v29 }
  0x4b   : > { %1615 = vmatmul.msk.bf16.gmra.mxu2 %vm306_vm1, %v1668_v30  ;;  %v1642_v30 = vld [vmem:[%s1791_s26 + $0x58] sm:$0xff] }
  0x59   : > { %1378 = vmatmul.msk.bf16.gmra.mxu0 %vm306_vm1, %v1635_v31  ;;  %1505 = vmatmul.msk.bf16.vlgmr.msrb.gmra.mxu3 %vm306_vm1, %v1660_v32  ;;  %v1680_v31 = vld [vmem:[%s1791_s26 + $0x88] sm:$0xff] }
  0x5a   : > { %1497 = vmatmul.msk.bf16.gmra.mxu1 %vm306_vm1, %v1652_v33 }
  0x5b   : > { %1616 = vmatmul.msk.bf16.gmra.mxu2 %vm306_vm1, %v1669_v34  ;;  %v1659_v34 = vld [vmem:[%s1791_s26 + $0x60] sm:$0xff] }
  0x69   : > { %1379 = vmatmul.msk.bf16.gmra.mxu0 %vm306_vm1, %v1636_v35  ;;  %1506 = vmatmul.msk.bf16.gmra.mxu3 %vm306_vm1, %v1661_v36  ;;  %v1676_v35 = vld [vmem:[%s1791_s26 + $0x68] sm:$0xff] }
  0x6a   : > { %1498 = vmatmul.msk.bf16.gmra.mxu1 %vm306_vm1, %v1653_v37 }
  0x6b   : > { %1617 = vmatmul.msk.bf16.gmra.mxu2 %vm306_vm1, %v1670_v38 }
  0x79   : > { %1380 = vmatmul.msk.bf16.gmra.mxu0 %vm306_vm1, %v1637_v39  ;;  %1507 = vmatmul.msk.bf16.gmra.mxu3 %vm306_vm1, %v1662_v40 }
  0x7a   : > { %1499 = vmatmul.msk.bf16.gmra.mxu1 %vm306_vm1, %v1654_v41 }
  0x7b   : > { %1618 = vmatmul.msk.bf16.gmra.mxu2 %vm306_vm1, %v1671_v42 }
  0x89   : > { %1381 = vmatmul.msk.bf16.gmra.mxu0 %vm306_vm1, %v1638_v43  ;;  %1508 = vmatmul.msk.bf16.gmra.mxu3 %vm306_vm1, %v1663_v44 }
  0x8a   : > { %1500 = vmatmul.msk.bf16.gmra.mxu1 %vm306_vm1, %v1655_v45 }
  0x8b   : > { %1619 = vmatmul.msk.bf16.gmra.mxu2 %vm306_vm1, %v1672_v46 }
  0x96   : > { %v368_v49 = vpop.f32.mrf.mxu0 }
  0x97   : > { %v666_v52 = vpop.f32.mrf.mxu1 }
  0x98   : > { %v778_v53 = vadd.f32 %v666_v52, %v368_v49 }
  0x99   : > { %1382 = vmatmul.msk.bf16.gmra.mxu0 %vm306_vm1, %v1639_v47  ;;  %1624 = vmatmul.msk.bf16.vlgmr.msra.gmra.mxu3 %vm306_vm1, %v1677_v48 }
  0x9a   : > { %1501 = vmatmul.msk.bf16.gmra.mxu1 %vm306_vm1, %v1656_v50 }
  0x9b   : > { %1620 = vmatmul.msk.bf16.gmra.mxu2 %vm306_vm1, %v1673_v51 }
  0x9c   : > { %v1869_v54 = vpop.f32.mrf.mxu3 }
  0x9e   : > { %v1028_v55 = vpop.f32.mrf.mxu2  ;;  %v370_v56 = vpop.f32.mrf.mxu0 }
  0x9f   : > { %v1140_v57 = vadd.f32 %v1028_v55, %v778_v53  ;;  %v668_v58 = vpop.f32.mrf.mxu1 }
  0xa0   : > { %v779_v59 = vadd.f32 %v668_v58, %v370_v56 }
  0xa1   : > { %1172 = vst [vmem:[%s1874_s4] sm:$0xff] %v1140_v57 }
  0xa4   : > { %v1877_v60 = vpop.f32.mrf.mxu3 }
  0xa6   : > { %v1030_v61 = vpop.f32.mrf.mxu2  ;;  %v373_v0 = vpop.f32.mrf.mxu0 }
  0xa7   : > { %v1141_v1 = vadd.f32 %v1030_v61, %v779_v59  ;;  %v671_v4 = vpop.f32.mrf.mxu1 }
  0xa8   : > { %v780_v5 = vadd.f32 %v671_v4, %v373_v0 }
  0xa9   : > { %1173 = vst [vmem:[%s1874_s4 + $0x8] sm:$0xff] %v1141_v1  ;;  %1383 = vmatmul.msk.bf16.gmra.mxu0 %vm306_vm1, %v1640_v62  ;;  %1625 = vmatmul.msk.bf16.gmra.mxu3 %vm306_vm1, %v1678_v63 }
  0xaa   : > { %1502 = vmatmul.msk.bf16.gmra.mxu1 %vm306_vm1, %v1657_v2 }
  0xab   : > { %1621 = vmatmul.msk.bf16.gmra.mxu2 %vm306_vm1, %v1674_v3 }
  0xac   : > { %v1888_v6 = vpop.f32.mrf.mxu3 }
  0xae   : > { %v1033_v7 = vpop.f32.mrf.mxu2  ;;  %v375_v8 = vpop.f32.mrf.mxu0 }
  0xaf   : > { %v1142_v9 = vadd.f32 %v1033_v7, %v780_v5  ;;  %v673_v10 = vpop.f32.mrf.mxu1 }
  0xb0   : > { %v781_v11 = vadd.f32 %v673_v10, %v375_v8 }
  0xb1   : > { %1174 = vst [vmem:[%s1874_s4 + $0x10] sm:$0xff] %v1142_v9 }
  0xb4   : > { %v1891_v12 = vpop.f32.mrf.mxu3 }
  0xb6   : > { %v1035_v13 = vpop.f32.mrf.mxu2  ;;  %v378_v16 = vpop.f32.mrf.mxu0 }
  0xb7   : > { %v1143_v17 = vadd.f32 %v1035_v13, %v781_v11  ;;  %v676_v20 = vpop.f32.mrf.mxu1 }
  0xb8   : > { %v782_v21 = vadd.f32 %v676_v20, %v378_v16 }
  0xb9   : > { %1175 = vst [vmem:[%s1874_s4 + $0x18] sm:$0xff] %v1143_v17  ;;  %1384 = vmatmul.msk.bf16.gmra.mxu0 %vm306_vm1, %v1641_v14  ;;  %1626 = vmatmul.msk.bf16.gmra.mxu3 %vm306_vm1, %v1679_v15 }
  0xba   : > { %1503 = vmatmul.msk.bf16.gmra.mxu1 %vm306_vm1, %v1658_v18 }
  0xbb   : > { %1622 = vmatmul.msk.bf16.gmra.mxu2 %vm306_vm1, %v1675_v19 }
  0xbc   : > { %v1902_v22 = vpop.f32.mrf.mxu3 }
  0xbe   : > { %v1038_v23 = vpop.f32.mrf.mxu2  ;;  %v380_v24 = vpop.f32.mrf.mxu0 }
  0xbf   : > { %v1144_v25 = vadd.f32 %v1038_v23, %v782_v21  ;;  %v678_v26 = vpop.f32.mrf.mxu1 }
  0xc0   : > { %v783_v27 = vadd.f32 %v678_v26, %v380_v24 }
  0xc1   : > { %1176 = vst [vmem:[%s1874_s4 + $0x20] sm:$0xff] %v1144_v25 }
  0xc4   : > { %v1905_v28 = vpop.f32.mrf.mxu3 }
  0xc6   : > { %v1040_v29 = vpop.f32.mrf.mxu2  ;;  %v383_v32 = vpop.f32.mrf.mxu0 }
  0xc7   : > { %v1145_v33 = vadd.f32 %v1040_v29, %v783_v27  ;;  %v681_v36 = vpop.f32.mrf.mxu1 }
  0xc8   : > { %v784_v37 = vadd.f32 %v681_v36, %v383_v32 }
  0xc9   : > { %1177 = vst [vmem:[%s1874_s4 + $0x28] sm:$0xff] %v1145_v33  ;;  %1385 = vmatmul.msk.bf16.gmra.mxu0 %vm306_vm1, %v1642_v30  ;;  %1627 = vmatmul.msk.bf16.gmra.mxu3 %vm306_vm1, %v1680_v31 }
  0xca   : > { %1504 = vmatmul.msk.bf16.gmra.mxu1 %vm306_vm1, %v1659_v34 }
  0xcb   : > { %1623 = vmatmul.msk.bf16.gmra.mxu2 %vm306_vm1, %v1676_v35 }
  0xcc   : > { %v1916_v38 = vpop.f32.mrf.mxu3 }
  0xce   : > { %v1043_v39 = vpop.f32.mrf.mxu2  ;;  %v385_v40 = vpop.f32.mrf.mxu0 }
  0xcf   : > { %v1146_v41 = vadd.f32 %v1043_v39, %v784_v37  ;;  %v683_v42 = vpop.f32.mrf.mxu1 }
  0xd0   : > { %v785_v43 = vadd.f32 %v683_v42, %v385_v40 }
  0xd1   : > { %1178 = vst [vmem:[%s1874_s4 + $0x30] sm:$0xff] %v1146_v41 }
  0xd4   : > { %v1919_v44 = vpop.f32.mrf.mxu3 }
  0xd6   : > { %v1045_v45 = vpop.f32.mrf.mxu2  ;;  %v388_v46 = vpop.f32.mrf.mxu0 }
  0xd7   : > { %v1147_v47 = vadd.f32 %v1045_v45, %v785_v43  ;;  %v686_v48 = vpop.f32.mrf.mxu1 }
  0xd8   : > { %v786_v49 = vadd.f32 %v686_v48, %v388_v46 }
  0xd9   : > { %1179 = vst [vmem:[%s1874_s4 + $0x38] sm:$0xff] %v1147_v47 }
  0xdc   : > { %v726_v50 = vpop.f32.mrf.mxu3 }
  0xdd   : > { %v802_v41 = vadd.f32 %v726_v50, %v1869_v54 }
  0xde   : > { %v1048_v51 = vpop.f32.mrf.mxu2  ;;  %v390_v52 = vpop.f32.mrf.mxu0 }
  0xdf   : > { %v1148_v53 = vadd.f32 %v1048_v51, %v786_v49  ;;  %v688_v55 = vpop.f32.mrf.mxu1 }
  0xe0   : > { %v787_v56 = vadd.f32 %v688_v55, %v390_v52 }
  0xe1   : > { %1180 = vst [vmem:[%s1874_s4 + $0x40] sm:$0xff] %v1148_v53 }
  0xe4   : > { %v728_v57 = vpop.f32.mrf.mxu3 }
  0xe5   : > { %v803_v49 = vadd.f32 %v728_v57, %v1877_v60 }
  0xe6   : > { %v1050_v58 = vpop.f32.mrf.mxu2  ;;  %v393_v59 = vpop.f32.mrf.mxu0 }
  0xe7   : > { %v1149_v61 = vadd.f32 %v1050_v58, %v787_v56  ;;  %v691_v62 = vpop.f32.mrf.mxu1 }
  0xe8   : > { %v788_v63 = vadd.f32 %v691_v62, %v393_v59 }
  0xe9   : > { %1181 = vst [vmem:[%s1874_s4 + $0x48] sm:$0xff] %v1149_v61 }
  0xec   : > { %v731_v0 = vpop.f32.mrf.mxu3 }
  0xed   : > { %v804_v59 = vadd.f32 %v731_v0, %v1888_v6 }
  0xee   : > { %v1053_v1 = vpop.f32.mrf.mxu2  ;;  %v395_v2 = vpop.f32.mrf.mxu0 }
  0xef   : > { %v1150_v3 = vadd.f32 %v1053_v1, %v788_v63  ;;  %v693_v4 = vpop.f32.mrf.mxu1 }
  0xf0   : > { %v789_v5 = vadd.f32 %v693_v4, %v395_v2 }
  0xf1   : > { %1182 = vst [vmem:[%s1874_s4 + $0x50] sm:$0xff] %v1150_v3 }
  0xf4   : > { %v1925_v7 = vpop.f32.mrf.mxu3 }
  0xf5   : > { %v805_v2 = vadd.f32 %v1925_v7, %v1891_v12 }
  0xf6   : > { %v1055_v8 = vpop.f32.mrf.mxu2  ;;  %v398_v9 = vpop.f32.mrf.mxu0 }
  0xf7   : > { %v1151_v10 = vadd.f32 %v1055_v8, %v789_v5  ;;  %v696_v11 = vpop.f32.mrf.mxu1 }
  0xf8   : > { %v790_v13 = vadd.f32 %v696_v11, %v398_v9 }
  0xf9   : > { %1183 = vst [vmem:[%s1874_s4 + $0x58] sm:$0xff] %v1151_v10 }
  0xfc   : > { %v1928_v14 = vpop.f32.mrf.mxu3 }
  0xfd   : > { %v806_v11 = vadd.f32 %v1928_v14, %v1902_v22 }
  0xfe   : > { %v1058_v15 = vpop.f32.mrf.mxu2  ;;  %v400_v16 = vpop.f32.mrf.mxu0 }
  0xff   : > { %v1152_v17 = vadd.f32 %v1058_v15, %v790_v13  ;;  %v698_v18 = vpop.f32.mrf.mxu1 }
 0x100   : > { %v791_v19 = vadd.f32 %v698_v18, %v400_v16 }
 0x101   : > { %1184 = vst [vmem:[%s1874_s4 + $0x60] sm:$0xff] %v1152_v17 }
 0x104   : > { %v1931_v20 = vpop.f32.mrf.mxu3 }
 0x105   : > { %v807_v18 = vadd.f32 %v1931_v20, %v1905_v28 }
 0x106   : > { %v1060_v21 = vpop.f32.mrf.mxu2  ;;  %v403_v23 = vpop.f32.mrf.mxu0 }
 0x107   : > { %v1153_v24 = vadd.f32 %v1060_v21, %v791_v19  ;;  %v701_v25 = vpop.f32.mrf.mxu1 }
 0x108   : > { %v792_v26 = vadd.f32 %v701_v25, %v403_v23 }
 0x109   : > { %1185 = vst [vmem:[%s1874_s4 + $0x68] sm:$0xff] %v1153_v24 }
 0x10c   : > { %v1934_v27 = vpop.f32.mrf.mxu3 }
 0x10e   : > { %v1063_v29 = vpop.f32.mrf.mxu2  ;;  %v405_v30 = vpop.f32.mrf.mxu0 }
 0x10f   : > { %v1154_v31 = vadd.f32 %v1063_v29, %v792_v26  ;;  %v703_v32 = vpop.f32.mrf.mxu1  ;;  %v808_v29 = vadd.f32 %v1934_v27, %v1916_v38 }
 0x110   : > { %v793_v33 = vadd.f32 %v703_v32, %v405_v30 }
 0x111   : > { %1186 = vst [vmem:[%s1874_s4 + $0x70] sm:$0xff] %v1154_v31 }
 0x114   : > { %v1937_v34 = vpop.f32.mrf.mxu3 }
 0x116   : > { %v1065_v35 = vpop.f32.mrf.mxu2  ;;  %v408_v36 = vpop.f32.mrf.mxu0 }
 0x117   : > { %v1155_v37 = vadd.f32 %v1065_v35, %v793_v33  ;;  %v706_v39 = vpop.f32.mrf.mxu1  ;;  %v809_v35 = vadd.f32 %v1937_v34, %v1919_v44 }
 0x118   : > { %v794_v40 = vadd.f32 %v706_v39, %v408_v36 }
 0x119   : > { %1187 = vst [vmem:[%s1874_s4 + $0x78] sm:$0xff] %v1155_v37 }
 0x11c   : > { %v1088_v42 = vpop.f32.mrf.mxu3 }
 0x11d   : > { %v1164_v43 = vadd.f32 %v1088_v42, %v802_v41 }
 0x11e   : > { %v1068_v45 = vpop.f32.mrf.mxu2  ;;  %v410_v46 = vpop.f32.mrf.mxu0 }
 0x11f   : > { %v1156_v47 = vadd.f32 %v1068_v45, %v794_v40  ;;  %1196 = vst [vmem:[%s1874_s4 + $0xc0] sm:$0xff] %v1164_v43  ;;  %v708_v48 = vpop.f32.mrf.mxu1 }
 0x120   : > { %v795_v51 = vadd.f32 %v708_v48, %v410_v46 }
 0x121   : > { %1188 = vst [vmem:[%s1874_s4 + $0x80] sm:$0xff] %v1156_v47 }
 0x124   : > { %v1090_v52 = vpop.f32.mrf.mxu3 }
 0x125   : > { %v1165_v53 = vadd.f32 %v1090_v52, %v803_v49 }
 0x126   : > { %v1070_v55 = vpop.f32.mrf.mxu2  ;;  %v413_v56 = vpop.f32.mrf.mxu0 }
 0x127   : > { %v1157_v54 = vadd.f32 %v1070_v55, %v795_v51  ;;  %1197 = vst [vmem:[%s1874_s4 + $0xc8] sm:$0xff] %v1165_v53  ;;  %v711_v50 = vpop.f32.mrf.mxu1 }
 0x128   : > { %v796_v58 = vadd.f32 %v711_v50, %v413_v56 }
 0x129   : > { %1189 = vst [vmem:[%s1874_s4 + $0x88] sm:$0xff] %v1157_v54 }
 0x12c   : > { %v1093_v61 = vpop.f32.mrf.mxu3 }
 0x12d   : > { %v1166_v62 = vadd.f32 %v1093_v61, %v804_v59 }
 0x12e   : > { %v1073_v63 = vpop.f32.mrf.mxu2  ;;  %v415_v60 = vpop.f32.mrf.mxu0 }
 0x12f   : > { %v1158_v57 = vadd.f32 %v1073_v63, %v796_v58  ;;  %1198 = vst [vmem:[%s1874_s4 + $0xd0] sm:$0xff] %v1166_v62  ;;  %v713_v1 = vpop.f32.mrf.mxu1 }
 0x130   : > { %v797_v3 = vadd.f32 %v713_v1, %v415_v60 }
 0x131   : > { %1190 = vst [vmem:[%s1874_s4 + $0x90] sm:$0xff] %v1158_v57 }
 0x134   : > { %v1095_v4 = vpop.f32.mrf.mxu3 }
 0x135   : > { %v1167_v5 = vadd.f32 %v1095_v4, %v805_v2 }
 0x136   : > { %v1075_v8 = vpop.f32.mrf.mxu2  ;;  %v418_v6 = vpop.f32.mrf.mxu0 }
 0x137   : > { %v1159_v0 = vadd.f32 %v1075_v8, %v797_v3  ;;  %1199 = vst [vmem:[%s1874_s4 + $0xd8] sm:$0xff] %v1167_v5  ;;  %v716_v9 = vpop.f32.mrf.mxu1 }
 0x138   : > { %v798_v10 = vadd.f32 %v716_v9, %v418_v6 }
 0x139   : > { %1191 = vst [vmem:[%s1874_s4 + $0x98] sm:$0xff] %v1159_v0 }
 0x13c   : > { %v1098_v13 = vpop.f32.mrf.mxu3 }
 0x13d   : > { %v1168_v15 = vadd.f32 %v1098_v13, %v806_v11 }
 0x13e   : > { %v1078_v12 = vpop.f32.mrf.mxu2  ;;  %v420_v7 = vpop.f32.mrf.mxu0 }
 0x13f   : > { %v1160_v16 = vadd.f32 %v1078_v12, %v798_v10  ;;  %1200 = vst [vmem:[%s1874_s4 + $0xe0] sm:$0xff] %v1168_v15  ;;  %v718_v17 = vpop.f32.mrf.mxu1 }
 0x140   : > { %v799_v19 = vadd.f32 %v718_v17, %v420_v7 }
 0x141   : > { %1192 = vst [vmem:[%s1874_s4 + $0xa0] sm:$0xff] %v1160_v16 }
 0x144   : > { %v1100_v21 = vpop.f32.mrf.mxu3 }
 0x145   : > { %v1169_v23 = vadd.f32 %v1100_v21, %v807_v18 }
 0x146   : > { %v1080_v24 = vpop.f32.mrf.mxu2  ;;  %v423_v22 = vpop.f32.mrf.mxu0 }
 0x147   : > { %v1161_v25 = vadd.f32 %v1080_v24, %v799_v19  ;;  %1201 = vst [vmem:[%s1874_s4 + $0xe8] sm:$0xff] %v1169_v23  ;;  %v721_v14 = vpop.f32.mrf.mxu1 }
 0x148   : > { %v800_v26 = vadd.f32 %v721_v14, %v423_v22 }
 0x149   : > { %1193 = vst [vmem:[%s1874_s4 + $0xa8] sm:$0xff] %v1161_v25 }
 0x14c   : > { %v1103_v30 = vpop.f32.mrf.mxu3 }
 0x14d   : > { %v1170_v31 = vadd.f32 %v1103_v30, %v808_v29 }
 0x14e   : > { %v1083_v28 = vpop.f32.mrf.mxu2  ;;  %v425_v32 = vpop.f32.mrf.mxu0 }
 0x14f   : > { %v1162_v20 = vadd.f32 %v1083_v28, %v800_v26  ;;  %1202 = vst [vmem:[%s1874_s4 + $0xf0] sm:$0xff] %v1170_v31  ;;  %v723_v33 = vpop.f32.mrf.mxu1 }
 0x150   : > { %v801_v36 = vadd.f32 %v723_v33, %v425_v32 }
 0x151   : > { %1194 = vst [vmem:[%s1874_s4 + $0xb0] sm:$0xff] %v1162_v20 }
 0x154   : > { %v1105_v37 = vpop.f32.mrf.mxu3 }
 0x155   : > { %v1171_v39 = vadd.f32 %v1105_v37, %v809_v35 }
 0x156   : > { %v1085_v40 = vpop.f32.mrf.mxu2 }
 0x157   : > { %v1163_v41 = vadd.f32 %v1085_v40, %v801_v36  ;;  %1203 = vst [vmem:[%s1874_s4 + $0xf8] sm:$0xff] %v1171_v39 }
 0x159   : > { %1195 = vst [vmem:[%s1874_s4 + $0xb8] sm:$0xff] %v1163_v41 }
 0x15a PF: > { %s12_s11 = sadd.s32 1, %s1735_s11   ;;  %s1981_s9 = smov %s1731_s10 }
 0x15b   : > { %p9_p5 = scmp.ge.s32.totalorder %s12_s11, 4   ;;  %s1982_s10 = smov %s1984_s12 }
 0x15d   :  { %11 = sbr.rel (!%p9_p5) target bundleno = 2 (0x2), region = 65 }

</bundles_post_ra>
